<compile_context>
chip_gen: v6e
topology: v6e:2x2x1
jax: 0.10.0
libtpu: 0.0.40
codegen_flags: <defaults>
</compile_context>

<pallas_src>
import functools

import jax
import jax.numpy as jnp
from jax.experimental import pallas as pl
from jax.experimental.pallas import tpu as pltpu

P_DROP = 0.1
# keep an element when its 24-bit uniform sample >= p * 2^24
_KEEP_THRESH_24 = int(round(P_DROP * (1 << 24)))
_SCALE = 1.0 / (1.0 - P_DROP)


def _softmax_dropout_kernel(seed_ref, x_ref, o_ref):
    # --- softmax over last (lane) axis, numerically stable ---
    x = x_ref[...]
    if x.dtype != jnp.float32:
        x = x.astype(jnp.float32)
    m = jnp.max(x, axis=-1, keepdims=True)
    e = jnp.exp(x - m)
    s = jnp.sum(e, axis=-1, keepdims=True)
    # fold the dropout 1/(1-p) scale into the per-row reciprocal (EUP slot)
    inv = pl.reciprocal(s, approx=True) * jnp.float32(_SCALE)

    # --- dropout mask from a counter-based hash (no TPU-only PRNG prims) ---
    rows, cols = x_ref.shape
    i = pl.program_id(0)
    r = jax.lax.broadcasted_iota(jnp.int32, (rows, cols), 0)
    c = jax.lax.broadcasted_iota(jnp.int32, (rows, cols), 1)
    # global element index, unique across the whole (R, D) array
    idx = ((i * rows + r) * cols + c).astype(jnp.uint32)

    seed = seed_ref[0].astype(jnp.uint32)
    h = idx + seed * jnp.uint32(0x9E3779B9)
    # murmur3 fmix32 finalizer (full avalanche)
    h = h ^ (h >> jnp.uint32(16))
    h = h * jnp.uint32(0x85EBCA6B)
    h = h ^ (h >> jnp.uint32(13))
    h = h * jnp.uint32(0xC2B2AE35)
    h = h ^ (h >> jnp.uint32(16))
    # top 24 bits as an integer uniform; signed compare against p * 2^24
    keep = (h >> jnp.uint32(8)).astype(jnp.int32) >= jnp.int32(_KEEP_THRESH_24)

    out = jnp.where(keep, e * inv, jnp.float32(0.0))
    o_ref[...] = out.astype(o_ref.dtype)


def _pick_row_tile(R, max_tile=512):
    """Largest divisor of R that is <= max_tile and a multiple of 8 (or R itself)."""
    for t in range(min(R, max_tile), 0, -1):
        if R % t == 0 and (t % 8 == 0 or t == R):
            return t
    return R


@functools.partial(jax.jit, static_argnames=("row_tile",))
def _softmax_dropout_2d(x2, seed, row_tile):
    R, D = x2.shape
    return pl.pallas_call(
        _softmax_dropout_kernel,
        out_shape=jax.ShapeDtypeStruct((R, D), x2.dtype),
        grid_spec=pltpu.PrefetchScalarGridSpec(
            num_scalar_prefetch=1,
            grid=(R // row_tile,),
            in_specs=[pl.BlockSpec((row_tile, D), lambda i, seed_ref: (i, 0))],
            out_specs=pl.BlockSpec((row_tile, D), lambda i, seed_ref: (i, 0)),
        ),
        compiler_params=pltpu.CompilerParams(
            # each row-tile is independent -> shard across TCs on v7x
            dimension_semantics=("parallel",),
        ),
    )(seed, x2)


def softmax_dropout(x, seed, row_tile=None):
    """x: (B, H, S, D). Returns dropout(softmax(x, axis=-1), p=0.1) (training mode)."""
    B, H, S, D = x.shape
    R = B * H * S
    if row_tile is None:
        # ~512 rows * D f32 per block (<1 MiB for the real D=384 shape); with
        # double-buffered in+out this stays well under v5e's 16 MiB scoped VMEM.
        row_tile = _pick_row_tile(R)
    assert R % row_tile == 0
    out = _softmax_dropout_2d(x.reshape(R, D), seed, row_tile)
    return out.reshape(B, H, S, D)


if __name__ == "__main__":
    key = jax.random.PRNGKey(0)
    # Small shape consistent with the module's (1, 12, 384, 384) softmax-over-last-dim
    B, H, S, D = 1, 4, 16, 128
    x = jax.random.normal(key, (B, H, S, D), dtype=jnp.float32)
    seed = jnp.array([42], dtype=jnp.int32)

    y = softmax_dropout(x, seed)
    y = jax.block_until_ready(y)
    assert y.shape == (B, H, S, D)

    # --- sanity checks against a pure-JAX reference ---
    probs_ref = jax.nn.softmax(x, axis=-1)
    kept = y != 0.0
    # every kept element must equal softmax(x) / (1 - p) (up to approx-recip error)
    descaled = jnp.where(kept, y * (1.0 - P_DROP), probs_ref)
    assert bool(jnp.all(jnp.abs(descaled - probs_ref) <= 1e-2 * probs_ref + 1e-6))
    assert bool(jnp.all(y >= 0.0))
    keep_frac = float(jnp.mean(kept.astype(jnp.float32)))
    assert 0.85 < keep_frac < 0.95, keep_frac

    print("KERNEL_OK")
</pallas_src>

<mosaic_0001>
module attributes {stable_mosaic.version = 11 : i64} {
  func.func @_softmax_dropout_kernel(%arg0: i32, %arg1: memref<1xi32, #tpu.memory_space<smem>>, %arg2: memref<64x128xf32, #tpu.memory_space<vmem>>, %arg3: memref<64x128xf32, #tpu.memory_space<vmem>>) attributes {dimension_semantics = [#tpu.dimension_semantics<parallel>], iteration_bounds = array<i64: 1>, scalar_prefetch = 1 : i64, scratch_operands = 0 : i64, tpu.core_type = #tpu.core_type<tc>, window_params = [{transform_indices = @transform_0, window_bounds = array<i64: 64, 128>}, {transform_indices = @transform_1, window_bounds = array<i64: 64, 128>}]} {
    %c0 = arith.constant 0 : index
    %c0_0 = arith.constant 0 : index
    %0 = vector.load %arg2[%c0, %c0_0] : memref<64x128xf32, #tpu.memory_space<vmem>>, vector<64x128xf32>
    %cst = arith.constant dense<0xFF800000> : vector<64xf32>
    %1 = vector.multi_reduction <maximumf>, %0, %cst [1] : vector<64x128xf32> to vector<64xf32>
    %2 = vector.shape_cast %1 : vector<64xf32> to vector<64x1xf32>
    %3 = vector.broadcast %2 : vector<64x1xf32> to vector<64x128xf32>
    %4 = arith.subf %0, %3 : vector<64x128xf32>
    %5 = math.exp %4 : vector<64x128xf32>
    %cst_1 = arith.constant dense<0.000000e+00> : vector<64xf32>
    %6 = vector.multi_reduction <add>, %5, %cst_1 [1] : vector<64x128xf32> to vector<64xf32>
    %7 = vector.shape_cast %6 : vector<64xf32> to vector<64x1xf32>
    %8 = tpu.reciprocal %7 {approx = true} : vector<64x1xf32> -> vector<64x1xf32>
    %cst_2 = arith.constant 1.11111116 : f32
    %9 = vector.broadcast %cst_2 : f32 to vector<64x1xf32>
    %10 = arith.mulf %8, %9 : vector<64x1xf32>
    %11 = tpu.iota {dimensions = array<i32: 0>} : vector<64x128xi32>
    %12 = tpu.iota {dimensions = array<i32: 1>} : vector<64x128xi32>
    %c64_i32 = arith.constant 64 : i32
    %13 = arith.muli %arg0, %c64_i32 : i32
    %14 = vector.broadcast %13 : i32 to vector<64x128xi32>
    %15 = arith.addi %14, %11 : vector<64x128xi32>
    %c128_i32 = arith.constant 128 : i32
    %16 = vector.broadcast %c128_i32 : i32 to vector<64x128xi32>
    %17 = arith.muli %15, %16 : vector<64x128xi32>
    %18 = arith.addi %17, %12 : vector<64x128xi32>
    %c0_3 = arith.constant 0 : index
    %19 = memref.load %arg1[%c0_3] : memref<1xi32, #tpu.memory_space<smem>>
    %c-1640531527_i32 = arith.constant -1640531527 : i32
    %20 = arith.muli %19, %c-1640531527_i32 : i32
    %21 = vector.broadcast %20 : i32 to vector<64x128xi32>
    %22 = arith.addi %18, %21 : vector<64x128xi32>
    %c16_i32 = arith.constant 16 : i32
    %23 = vector.broadcast %c16_i32 : i32 to vector<64x128xi32>
    %24 = arith.shrui %22, %23 : vector<64x128xi32>
    %25 = arith.xori %22, %24 : vector<64x128xi32>
    %c-2048144789_i32 = arith.constant -2048144789 : i32
    %26 = vector.broadcast %c-2048144789_i32 : i32 to vector<64x128xi32>
    %27 = arith.muli %25, %26 : vector<64x128xi32>
    %c13_i32 = arith.constant 13 : i32
    %28 = vector.broadcast %c13_i32 : i32 to vector<64x128xi32>
    %29 = arith.shrui %27, %28 : vector<64x128xi32>
    %30 = arith.xori %27, %29 : vector<64x128xi32>
    %c-1028477387_i32 = arith.constant -1028477387 : i32
    %31 = vector.broadcast %c-1028477387_i32 : i32 to vector<64x128xi32>
    %32 = arith.muli %30, %31 : vector<64x128xi32>
    %c16_i32_4 = arith.constant 16 : i32
    %33 = vector.broadcast %c16_i32_4 : i32 to vector<64x128xi32>
    %34 = arith.shrui %32, %33 : vector<64x128xi32>
    %35 = arith.xori %32, %34 : vector<64x128xi32>
    %c8_i32 = arith.constant 8 : i32
    %36 = vector.broadcast %c8_i32 : i32 to vector<64x128xi32>
    %37 = arith.shrui %35, %36 : vector<64x128xi32>
    %c1677722_i32 = arith.constant 1677722 : i32
    %38 = vector.broadcast %c1677722_i32 : i32 to vector<64x128xi32>
    %39 = arith.cmpi sge, %37, %38 : vector<64x128xi32>
    %40 = vector.broadcast %10 : vector<64x1xf32> to vector<64x128xf32>
    %41 = arith.mulf %5, %40 : vector<64x128xf32>
    %cst_5 = arith.constant 0.000000e+00 : f32
    %42 = vector.broadcast %cst_5 : f32 to vector<64x128xf32>
    %43 = arith.select %39, %41, %42 : vector<64x128xi1>, vector<64x128xf32>
    %c0_6 = arith.constant 0 : index
    %c0_7 = arith.constant 0 : index
    %44 = vector.load %arg3[%c0_6, %c0_7] : memref<64x128xf32, #tpu.memory_space<vmem>>, vector<64x128xf32>
    tpu.vector_store %arg3[%c0_6, %c0_7], %43 {strides = array<i32>} : memref<64x128xf32, #tpu.memory_space<vmem>>, vector<64x128xf32>,
    return
  }
  func.func @transform_0(%arg0: i32, %arg1: memref<1xi32, #tpu.memory_space<smem>>) -> (i32, i32) {
    %c0_i32 = arith.constant 0 : i32
    %c0_i32_0 = arith.constant 0 : i32
    return %arg0, %c0_i32 : i32, i32
  }
  func.func @transform_1(%arg0: i32, %arg1: memref<1xi32, #tpu.memory_space<smem>>) -> (i32, i32) {
    %c0_i32 = arith.constant 0 : i32
    %c0_i32_0 = arith.constant 0 : i32
    return %arg0, %c0_i32 : i32, i32
  }
}

</mosaic_0001>

<bundles_post_ra>
// kernel: _softmax_dropout_2d.1
= control target key start
LH: loop header
LB: loop body
LE: loop exit
PB: predicated region body
PF: predicated region fallthrough
CT: control target
= control target key end

     0   :  { %8 = vsyncpa [#allocation5], 0  ;;  %s426_s0 = inlined_call_operand.<no memory space> [shape: s32[1], index: 0, kind: input, shape index: {}]   ;;  %s427_s1 = inlined_call_operand.hbm [shape: f32[64,128], index: 1, kind: input, shape index: {}]   ;;  %s428_s2 = inlined_call_operand.hbm [shape: f32[64,128], index: 2, kind: output, shape index: {}]  }
   0x1   :  { %9 = vsyncpa [#allocation6], 0  ;;  %s354_s9 = smov [#allocation4]  }
   0x2   :  { %s15_s10 = sshll.u32 %s354_s9, 4  ;;  %s16_s10 = int_to_ptr.vmem [resolvable:$true] %s15_s10 }
   0x3   :  { %s318_s11 = scalar_lea.vmem %s16_s10, 1024  ;;  %p323_p1 = scmp.lt.s32.totalorder %s16_s10, %s16_s10 }
   0x4   :  { %p319_p0 = scmp.ne.s32.totalorder %s16_s10, %s318_s11  ;;  %p324_p2 = scmp.lt.s32.totalorder %s318_s11, %s318_s11 }
   0x6   :  { %p325_p3 = por %p324_p2, %p323_p1 }
   0x8   :  { %p326_p4 = pnand %p325_p3, %p319_p0 }
   0xa   :  { %329 = shalt.err (!%p326_p4)
}
   0xb   :  { %s355_s12 = smov 128   ;;  %s356_s13 = smov 8  }
   0xc   :  { %21 = dma.hbm_to_vmem [thread:$0]  %s427_s1, 1024, %s16_s10, [#allocation5], %s355_s12, %s355_s12, %s356_s13  }
   0xd   :  { %350 = dma.done.wait [#allocation5], 1024  }
   0xe   :  { %351 = vsyncadd [#allocation5], 4294966272  ;;  %v25_v0 = vld [vmem:[#allocation4] sm:$0xff]  ;;  %v27_v1 = vld [vmem:[#allocation4 + $0x10] sm:$0xff]  ;;  %v105_v40 = vlaneseq  ;;  %s143_s17 = smul.u32 2654435769, %s426_s0 }
   0xf   :  { %33 = vmax.xlane.f32.xlu0 %v25_v0  ;;  %37 = vmax.xlane.f32.xlu1 %v27_v1  ;;  %v26_v2 = vld [vmem:[#allocation4 + $0x8] sm:$0xff]  ;;  %v28_v3 = vld [vmem:[#allocation4 + $0x18] sm:$0xff]  ;;  %v29_v4 = vld [vmem:[#allocation4 + $0x20] sm:$0xff]  ;;  %s357_s0 = smov [#allocation7]  }
  0x10   :  { %v30_v5 = vld [vmem:[#allocation4 + $0x28] sm:$0xff]  ;;  %v31_v6 = vld [vmem:[#allocation4 + $0x30] sm:$0xff]  ;;  %v32_v7 = vld [vmem:[#allocation4 + $0x38] sm:$0xff]  ;;  %v106_v41 = vshrl.u32 %v105_v40, 7  ;;  %v115_v42 = vand.u32 127, %v105_v40  ;;  %v144_v48 = vstv %s143_s17  ;;  %s262_s18 = sshll.u32 %s357_s0, 4  ;;  %s263_s18 = int_to_ptr.vmem [resolvable:$true] %s262_s18 }
  0x11   :  { %s330_s19 = scalar_lea.vmem %s263_s18, 1024  ;;  %p335_p6 = scmp.lt.s32.totalorder %s263_s18, %s263_s18 }
  0x12   :  { %v126_v43 = vmul.u32 128, %v106_v41  ;;  %v107_v44 = vadd.s32 8, %v106_v41  ;;  %v108_v45 = vadd.s32 16, %v106_v41  ;;  %v109_v50 = vadd.s32 24, %v106_v41  ;;  %p331_p5 = scmp.ne.s32.totalorder %s263_s18, %s330_s19  ;;  %p336_p7 = scmp.lt.s32.totalorder %s330_s19, %s330_s19 }
  0x13   :  { %35 = vmax.xlane.f32.xlu0 %v26_v2  ;;  %39 = vmax.xlane.f32.xlu1 %v28_v3  ;;  %v110_v51 = vadd.s32 32, %v106_v41  ;;  %v111_v54 = vadd.s32 40, %v106_v41  ;;  %v112_v58 = vadd.s32 48, %v106_v41 }
  0x14   :  { %v134_v46 = vadd.s32 %v126_v43, %v115_v42  ;;  %v127_v47 = vmul.u32 128, %v107_v44  ;;  %v128_v49 = vmul.u32 128, %v108_v45  ;;  %p337_p8 = por %p336_p7, %p335_p6 }
  0x15   :  { %v129_v56 = vmul.u32 128, %v109_v50  ;;  %v130_v57 = vmul.u32 128, %v110_v51 }
  0x16   :  { %v145_v52 = vadd.s32 %v144_v48, %v134_v46  ;;  %v135_v53 = vadd.s32 %v127_v47, %v115_v42  ;;  %v136_v55 = vadd.s32 %v128_v49, %v115_v42  ;;  %v131_v61 = vmul.u32 128, %v111_v54  ;;  %p338_p9 = pnand %p337_p8, %p331_p5 }
  0x17   :  { %41 = vmax.xlane.f32.xlu0 %v29_v4  ;;  %43 = vmax.xlane.f32.xlu1 %v30_v5  ;;  %v137_v63 = vadd.s32 %v129_v56, %v115_v42 }
  0x18   :  { %v153_v59 = vshrl.u32 %v145_v52, 16  ;;  %v146_v60 = vadd.s32 %v144_v48, %v135_v53  ;;  %v147_v62 = vadd.s32 %v144_v48, %v136_v55 }
  0x1b   :  { %45 = vmax.xlane.f32.xlu0 %v31_v6  ;;  %47 = vmax.xlane.f32.xlu1 %v32_v7 }
  0x98   :  { %v34_v8 = vpop.xlane.xlu0 %33  ;;  %v38_v9 = vpop.xlane.xlu1 %37 }
  0x99   :  { %v49_v10 = vsub.f32 %v25_v0, %v34_v8  ;;  %v51_v11 = vsub.f32 %v27_v1, %v38_v9  ;;  %v113_v0 = vadd.s32 56, %v106_v41  ;;  %v138_v1 = vadd.s32 %v130_v57, %v115_v42 }
  0x9b   :  { %v57_v12 = vmul.f32 1.442695, %v49_v10  ;;  %v61_v13 = vmul.f32 1.442695, %v51_v11  ;;  %v133_v8 = vmul.u32 128, %v113_v0  ;;  %v149_v9 = vadd.s32 %v144_v48, %v138_v1 }
  0x9c   :  { %v36_v14 = vpop.xlane.xlu0 %35  ;;  %v40_v15 = vpop.xlane.xlu1 %39 }
  0x9d   :  { %278 = vpow2.f32 %v57_v12  ;;  %v50_v16 = vsub.f32 %v26_v2, %v36_v14  ;;  %v52_v17 = vsub.f32 %v28_v3, %v40_v15  ;;  %v132_v2 = vmul.u32 128, %v112_v58 }
  0x9e   :  { %280 = vpow2.f32 %v61_v13  ;;  %v161_v3 = vxor.u32 %v153_v59, %v145_v52 }
  0x9f   :  { %v59_v18 = vmul.f32 1.442695, %v50_v16  ;;  %v63_v19 = vmul.f32 1.442695, %v52_v17  ;;  %v140_v10 = vadd.s32 %v132_v2, %v115_v42  ;;  %v141_v16 = vadd.s32 %v133_v8, %v115_v42 }
  0xa0   :  { %v42_v20 = vpop.xlane.xlu0 %41  ;;  %v44_v21 = vpop.xlane.xlu1 %43  ;;  %v169_v11 = vmul.u32 2246822507, %v161_v3  ;;  %v157_v17 = vshrl.u32 %v149_v9, 16 }
  0xa1   :  { %282 = vpow2.f32 %v59_v18  ;;  %v53_v22 = vsub.f32 %v29_v4, %v42_v20  ;;  %v54_v23 = vsub.f32 %v30_v5, %v44_v21  ;;  %v154_v4 = vshrl.u32 %v146_v60, 16 }
  0xa2   :  { %284 = vpow2.f32 %v63_v19  ;;  %v139_v5 = vadd.s32 %v131_v61, %v115_v42  ;;  %v151_v18 = vadd.s32 %v144_v48, %v140_v10  ;;  %v177_v19 = vshrl.u32 %v169_v11, 13 }
  0xa3   :  { %v65_v24 = vmul.f32 1.442695, %v53_v22  ;;  %v67_v25 = vmul.f32 1.442695, %v54_v23  ;;  %v162_v12 = vxor.u32 %v154_v4, %v146_v60 }
  0xa4   :  { %v46_v26 = vpop.xlane.xlu0 %45  ;;  %v48_v27 = vpop.xlane.xlu1 %47  ;;  %v150_v13 = vadd.s32 %v144_v48, %v139_v5 }
  0xa5   :  { %286 = vpow2.f32 %v65_v24  ;;  %v55_v28 = vsub.f32 %v31_v6, %v46_v26  ;;  %v56_v29 = vsub.f32 %v32_v7, %v48_v27  ;;  %v155_v6 = vshrl.u32 %v147_v62, 16 }
  0xa6   :  { %288 = vpow2.f32 %v67_v25  ;;  %v148_v7 = vadd.s32 %v144_v48, %v137_v63  ;;  %v170_v20 = vmul.u32 2246822507, %v162_v12  ;;  %v158_v21 = vshrl.u32 %v150_v13, 16 }
  0xa7   :  { %v69_v30 = vmul.f32 1.442695, %v55_v28  ;;  %v71_v31 = vmul.f32 1.442695, %v56_v29  ;;  %v163_v14 = vxor.u32 %v155_v6, %v147_v62  ;;  %v152_v24 = vadd.s32 %v144_v48, %v141_v16 }
  0xa8   :  { %v156_v15 = vshrl.u32 %v148_v7, 16  ;;  %v165_v25 = vxor.u32 %v157_v17, %v149_v9  ;;  %v159_v26 = vshrl.u32 %v151_v18, 16  ;;  %v185_v27 = vxor.u32 %v177_v19, %v169_v11 }
  0xa9   :  { %290 = vpow2.f32 %v69_v30  ;;  %v171_v22 = vmul.u32 2246822507, %v163_v14  ;;  %v178_v28 = vshrl.u32 %v170_v20, 13  ;;  %v166_v29 = vxor.u32 %v158_v21, %v150_v13 }
  0xaa   :  { %v379_v32 = vpop.eup %278  ;;  %292 = vpow2.f32 %v71_v31  ;;  %v164_v23 = vxor.u32 %v156_v15, %v148_v7  ;;  %v160_v40 = vshrl.u32 %v152_v24, 16  ;;  %v173_v41 = vmul.u32 2246822507, %v165_v25 }
  0xab   :  { %73 = vadd.xlane.f32.xlu0 %v379_v32  ;;  %v382_v33 = vpop.eup %280  ;;  %v179_v30 = vshrl.u32 %v171_v22, 13  ;;  %v167_v43 = vxor.u32 %v159_v26, %v151_v18  ;;  %v193_v44 = vmul.u32 3266489909, %v185_v27  ;;  %v186_v42 = vxor.u32 %v178_v28, %v170_v20 }
  0xac   :  { %v172_v31 = vmul.u32 2246822507, %v164_v23  ;;  %v174_v45 = vmul.u32 2246822507, %v166_v29  ;;  %v168_v50 = vxor.u32 %v160_v40, %v152_v24  ;;  %v181_v51 = vshrl.u32 %v173_v41, 13 }
  0xad   :  { %v187_v47 = vxor.u32 %v179_v30, %v171_v22  ;;  %v175_v48 = vmul.u32 2246822507, %v167_v43  ;;  %v201_v52 = vshrl.u32 %v193_v44, 16  ;;  %v194_v53 = vmul.u32 3266489909, %v186_v42 }
  0xae   :  { %v384_v34 = vpop.eup %282  ;;  %v180_v49 = vshrl.u32 %v172_v31, 13  ;;  %v182_v54 = vshrl.u32 %v174_v45, 13  ;;  %v176_v59 = vmul.u32 2246822507, %v168_v50  ;;  %v189_v60 = vxor.u32 %v181_v51, %v173_v41 }
  0xaf   :  { %77 = vadd.xlane.f32.xlu0 %v382_v33  ;;  %75 = vadd.xlane.f32.xlu1 %v384_v34  ;;  %v388_v35 = vpop.eup %284  ;;  %v195_v56 = vmul.u32 3266489909, %v187_v47  ;;  %v183_v61 = vshrl.u32 %v175_v48, 13  ;;  %v209_v62 = vxor.u32 %v201_v52, %v193_v44  ;;  %v202_v0 = vshrl.u32 %v194_v53, 16 }
  0xb0   :  { %v188_v58 = vxor.u32 %v180_v49, %v172_v31  ;;  %v190_v63 = vxor.u32 %v182_v54, %v174_v45  ;;  %v184_v5 = vshrl.u32 %v176_v59, 13  ;;  %v197_v6 = vmul.u32 3266489909, %v189_v60 }
  0xb1   :  { %v203_v1 = vshrl.u32 %v195_v56, 16  ;;  %v191_v7 = vxor.u32 %v183_v61, %v175_v48  ;;  %v217_v8 = vshrl.u32 %v209_v62, 8  ;;  %v210_v10 = vxor.u32 %v202_v0, %v194_v53 }
  0xb2   :  { %v390_v36 = vpop.eup %286  ;;  %v196_v2 = vmul.u32 3266489909, %v188_v58  ;;  %v198_v9 = vmul.u32 3266489909, %v190_v63  ;;  %v192_v15 = vxor.u32 %v184_v5, %v176_v59  ;;  %v205_v16 = vshrl.u32 %v197_v6, 16 }
  0xb3   :  { %79 = vadd.xlane.f32.xlu1 %v388_v35  ;;  %81 = vadd.xlane.f32.xlu0 %v390_v36  ;;  %v394_v37 = vpop.eup %288  ;;  %v211_v11 = vxor.u32 %v203_v1, %v195_v56  ;;  %v199_v17 = vmul.u32 3266489909, %v191_v7  ;;  %vm406_vm0 = vcmp.ge.s32.totalorder %v217_v8, 1677722  ;;  %v218_v22 = vshrl.u32 %v210_v10, 8 }
  0xb4   :  { %v204_v12 = vshrl.u32 %v196_v2, 16  ;;  %v206_v21 = vshrl.u32 %v198_v9, 16  ;;  %v200_v25 = vmul.u32 3266489909, %v192_v15  ;;  %v213_v28 = vxor.u32 %v205_v16, %v197_v6 }
  0xb5   :  { %v219_v23 = vshrl.u32 %v211_v11, 8  ;;  %v207_v29 = vshrl.u32 %v199_v17, 16  ;;  %vm226_vm1 = vcmp.ge.s32.totalorder %v218_v22, 1677722 }
  0xb6   :  { %v396_v38 = vpop.eup %290  ;;  %v212_v24 = vxor.u32 %v204_v12, %v196_v2  ;;  %v214_v43 = vxor.u32 %v206_v21, %v198_v9  ;;  %v208_v45 = vshrl.u32 %v200_v25, 16  ;;  %v221_v47 = vshrl.u32 %v213_v28, 8 }
  0xb7   :  { %83 = vadd.xlane.f32.xlu1 %v394_v37  ;;  %85 = vadd.xlane.f32.xlu0 %v396_v38  ;;  %v400_v39 = vpop.eup %292  ;;  %vm227_vm2 = vcmp.ge.s32.totalorder %v219_v23, 1677722 }
  0xb8   :  { %v220_v42 = vshrl.u32 %v212_v24, 8  ;;  %v222_v53 = vshrl.u32 %v214_v43, 8  ;;  %v216_v56 = vxor.u32 %v208_v45, %v200_v25  ;;  %vm229_vm4 = vcmp.ge.s32.totalorder %v221_v47, 1677722 }
  0xba   :  { %vm228_vm3 = vcmp.ge.s32.totalorder %v220_v42, 1677722  ;;  %vm230_vm5 = vcmp.ge.s32.totalorder %v222_v53, 1677722  ;;  %v224_v0 = vshrl.u32 %v216_v56, 8 }
  0xbb   :  { %87 = vadd.xlane.f32.xlu1 %v400_v39 }
  0xbc   :  { %vm232_vm7 = vcmp.ge.s32.totalorder %v224_v0, 1677722 }
 0x134   :  { %v74_v46 = vpop.xlane.xlu0 %73 }
 0x135   :  { %294 = vrcp.f32 %v74_v46 }
 0x138   :  { %v76_v55 = vpop.xlane.xlu1 %75  ;;  %v78_v57 = vpop.xlane.xlu0 %77 }
 0x139   :  { %296 = vrcp.f32 %v76_v55 }
 0x13a   :  { %298 = vrcp.f32 %v78_v57 }
 0x13c   :  { %v80_v3 = vpop.xlane.xlu1 %79  ;;  %v82_v4 = vpop.xlane.xlu0 %81 }
 0x13d   :  { %300 = vrcp.f32 %v80_v3 }
 0x13e   :  { %302 = vrcp.f32 %v82_v4 }
 0x140   :  { %v84_v13 = vpop.xlane.xlu1 %83  ;;  %v86_v14 = vpop.xlane.xlu0 %85 }
 0x141   :  { %304 = vrcp.f32 %v84_v13 }
 0x142   :  { %v295_v18 = vpop.eup %294  ;;  %306 = vrcp.f32 %v86_v14 }
 0x143   :  { %v97_v20 = vmul.f32 1.1111112, %v295_v18 }
 0x144   :  { %v88_v26 = vpop.xlane.xlu1 %87 }
 0x145   :  { %v233_v27 = vmul.f32 %v379_v32, %v97_v20  ;;  %308 = vrcp.f32 %v88_v26  ;;  %v215_v32 = vxor.u32 %v207_v29, %v199_v17 }
 0x146   :  { %v297_v30 = vpop.eup %296 }
 0x147   :  { %v299_v31 = vpop.eup %298  ;;  %v241_v40 = vsel %vm406_vm0, %v233_v27, 0.0  ;;  %v98_v41 = vmul.f32 1.1111112, %v297_v30 }
 0x148   :  { %249 = vst [vmem:[#allocation7] sm:$0xff] %v241_v40  ;;  %v99_v44 = vmul.f32 1.1111112, %v299_v31 }
 0x149   :  { %v234_v46 = vmul.f32 %v384_v34, %v98_v41  ;;  %v223_v34 = vshrl.u32 %v215_v32, 8 }
 0x14a   :  { %v301_v49 = vpop.eup %300  ;;  %v235_v50 = vmul.f32 %v382_v33, %v99_v44 }
 0x14b   :  { %v303_v51 = vpop.eup %302  ;;  %v242_v48 = vsel %vm226_vm1, %v234_v46, 0.0  ;;  %v100_v52 = vmul.f32 1.1111112, %v301_v49  ;;  %vm231_vm6 = vcmp.ge.s32.totalorder %v223_v34, 1677722 }
 0x14c   :  { %250 = vst [vmem:[#allocation7 + $0x8] sm:$0xff] %v242_v48  ;;  %v243_v54 = vsel %vm227_vm2, %v235_v50, 0.0  ;;  %v101_v55 = vmul.f32 1.1111112, %v303_v51 }
 0x14d   :  { %251 = vst [vmem:[#allocation7 + $0x10] sm:$0xff] %v243_v54  ;;  %v236_v57 = vmul.f32 %v388_v35, %v100_v52 }
 0x14e   :  { %v305_v58 = vpop.eup %304  ;;  %v237_v59 = vmul.f32 %v390_v36, %v101_v55 }
 0x14f   :  { %v307_v60 = vpop.eup %306  ;;  %v244_v61 = vsel %vm228_vm3, %v236_v57, 0.0  ;;  %v102_v33 = vmul.f32 1.1111112, %v305_v58 }
 0x150   :  { %252 = vst [vmem:[#allocation7 + $0x18] sm:$0xff] %v244_v61  ;;  %v245_v62 = vsel %vm229_vm4, %v237_v59, 0.0  ;;  %v103_v63 = vmul.f32 1.1111112, %v307_v60 }
 0x151   :  { %253 = vst [vmem:[#allocation7 + $0x20] sm:$0xff] %v245_v62  ;;  %v238_v1 = vmul.f32 %v394_v37, %v102_v33 }
 0x152   :  { %v309_v2 = vpop.eup %308  ;;  %v239_v35 = vmul.f32 %v396_v38, %v103_v63 }
 0x153   :  { %v246_v3 = vsel %vm230_vm5, %v238_v1, 0.0  ;;  %v104_v4 = vmul.f32 1.1111112, %v309_v2 }
 0x154   :  { %254 = vst [vmem:[#allocation7 + $0x28] sm:$0xff] %v246_v3  ;;  %v247_v36 = vsel %vm231_vm6, %v239_v35, 0.0 }
 0x155   :  { %255 = vst [vmem:[#allocation7 + $0x30] sm:$0xff] %v247_v36  ;;  %v240_v5 = vmul.f32 %v400_v39, %v104_v4 }
 0x157   :  { %v248_v6 = vsel %vm232_vm7, %v240_v5, 0.0 }
 0x158   :  { %256 = vst [vmem:[#allocation7 + $0x38] sm:$0xff] %v248_v6 }
 0x159   :  { %341 = shalt.err (!%p338_p9)
}
 0x15a   :  { %268 = dma.vmem_to_hbm [thread:$0]  %s263_s18, 1024, %s428_s2, [#allocation6], %s355_s12, %s355_s12, %s356_s13  }
 0x15b   :  { %352 = dma.done.wait [#allocation6], 1024  }
 0x15c   :  { %353 = vsyncadd [#allocation6], 4294966272 }
 0x15d   :  { %272 = vsyncpa [#allocation5], 1 }
 0x15e   :  { %273 = vsyncpa [#allocation6], 1 }

</bundles_post_ra>
